<compile_context>
chip_gen: v7x
topology: tpu7x:2x2x1
jax: 0.10.0
libtpu: 0.0.40
codegen_flags: <defaults>
</compile_context>

<pallas_src>
import jax
import jax.numpy as jnp
from jax.experimental import pallas as pl
from jax.experimental.pallas import tpu as pltpu


def _binary_classifier_kernel(
    scalars_ref,                                   # SMEM (3,): [att_b, gamma, b3]
    emb_ref, td_ref, sd_ref, aw_ref,               # data + attention weight
    w1e_ref, w1s_ref, b1_ref, w2_ref, b2_ref, w3_ref,
    out_ref,                                       # (1, 1, TB) lane-dense output
):
    att_b = scalars_ref[0]
    gamma = scalars_ref[1]
    b3 = scalars_ref[2]

    D = emb_ref.shape[1]                           # static number of documents
    aw = aw_ref[...]                               # (1, E) attention linear weight

    # ---- Pass over documents (statically unrolled, everything stays 2D) ----
    en, logit, w_td = [], [], []
    for d in range(D):
        e_d = emb_ref[:, d, :]                     # (TB, E)
        # L2-normalize along E with zero-norm guard (rsqrt -> EUP).
        ss = jnp.sum(e_d * e_d, axis=-1, keepdims=True)        # (TB, 1)
        inv = jnp.where(ss == 0.0, 1.0, jax.lax.rsqrt(ss))
        en_d = e_d * inv
        en.append(en_d)
        # attention = Linear(E, 1) as VPU multiply + lane reduce (no N=1 MXU dot)
        logit.append(jnp.sum(en_d * aw, axis=-1, keepdims=True) + att_b)
        # time weighting * validity mask
        td_d = td_ref[:, d:d + 1]                  # (TB, 1)
        valid_d = (td_d != -1.0).astype(jnp.float32)
        decay_d = jnp.exp(-jnp.maximum(td_d, 0.0) * gamma)
        w_td.append(valid_d * decay_d)

    # ---- softmax over the document axis (per row, numerically stable) ----
    m = logit[0]
    for d in range(1, D):
        m = jnp.maximum(m, logit[d])
    p = [jnp.exp(l - m) for l in logit]
    psum = p[0]
    for d in range(1, D):
        psum = psum + p[d]
    r = pl.reciprocal(psum, approx=True)           # EUP

    # combined weights + renormalisation (clamp at 1e-8, matching torch)
    cw = [p_d * r * w_d for p_d, w_d in zip(p, w_td)]
    csum = cw[0]
    for d in range(1, D):
        csum = csum + cw[d]
    rc = pl.reciprocal(jnp.maximum(csum, 1e-8), approx=True)

    agg = cw[0] * en[0]
    for d in range(1, D):
        agg = agg + cw[d] * en[d]
    agg = agg * rc                                 # (TB, E) f32 aggregated embedding

    # ---- MLP head: concat([agg, sd]) @ W1 == agg @ W1e + sd @ W1s (bf16 MXU) ----
    h1 = jnp.dot(agg.astype(jnp.bfloat16), w1e_ref[...],
                 preferred_element_type=jnp.float32)
    h1 = h1 + jnp.dot(sd_ref[...].astype(jnp.bfloat16), w1s_ref[...],
                      preferred_element_type=jnp.float32)
    h1 = jnp.maximum(h1 + b1_ref[...], 0.0)
    # dropout(0.3) is identity at inference time
    h2 = jnp.dot(h1.astype(jnp.bfloat16), w2_ref[...],
                 preferred_element_type=jnp.float32)
    h2 = jnp.maximum(h2 + b2_ref[...], 0.0)        # (TB, H2)

    # ---- final projection, produced directly as a lane-dense (1, TB) row ----
    # z[0, b] = sum_h w3[0, h] * h2[b, h]
    z = jax.lax.dot_general(w3_ref[...], h2,
                            dimension_numbers=(((1,), (1,)), ((), ())),
                            preferred_element_type=jnp.float32) + b3
    out_ref[0] = jax.nn.sigmoid(z)                 # (1, TB)


def init_params(key, embedding_dim, num_structured, hidden1=256, hidden2=64):
    ks = jax.random.split(key, 7)
    s = 0.05
    f32 = jnp.float32
    return {
        "att_w": jax.random.normal(ks[0], (1, embedding_dim), f32) * s,   # (1, E)
        "att_b": jnp.array(0.0, f32),
        "gamma": jnp.array(0.1, f32),
        # MLP weights stored in bf16 (bf16-native MXU); biases kept f32.
        "w1e": (jax.random.normal(ks[1], (embedding_dim, hidden1), f32) * s).astype(jnp.bfloat16),
        "w1s": (jax.random.normal(ks[2], (num_structured, hidden1), f32) * s).astype(jnp.bfloat16),
        "b1": jax.random.normal(ks[3], (1, hidden1), f32) * s,
        "w2": (jax.random.normal(ks[4], (hidden1, hidden2), f32) * s).astype(jnp.bfloat16),
        "b2": jax.random.normal(ks[5], (1, hidden2), f32) * s,
        "w3": jax.random.normal(ks[6], (1, hidden2), f32) * s,            # torch fc3.weight layout
        "b3": jnp.array(0.0, f32),
    }


def binary_classification_forward(emb, td, sd, params, batch_tile=128):
    emb = emb.astype(jnp.float32)
    td = td.astype(jnp.float32)
    sd = sd.astype(jnp.float32)

    B, D, E = emb.shape
    S = sd.shape[1]
    H1 = params["w1e"].shape[1]
    H2 = params["w2"].shape[1]

    # Batch tile: single tile for small batches, 128-row tiles (multiple of 8,
    # fills the MXU M dimension, fits comfortably in VMEM) for large batches.
    tb = B if B <= batch_tile else batch_tile
    num_tiles = pl.cdiv(B, tb)
    b_pad = num_tiles * tb
    if b_pad != B:
        pad = b_pad - B
        emb = jnp.pad(emb, ((0, pad), (0, 0), (0, 0)))
        td = jnp.pad(td, ((0, pad), (0, 0)), constant_values=-1.0)  # padded docs invalid
        sd = jnp.pad(sd, ((0, pad), (0, 0)))

    scalars = jnp.stack([
        jnp.asarray(params["att_b"], jnp.float32),
        jnp.asarray(params["gamma"], jnp.float32),
        jnp.asarray(params["b3"], jnp.float32),
    ])                                                           # (3,) -> SMEM

    grid_spec = pltpu.PrefetchScalarGridSpec(
        num_scalar_prefetch=1,
        grid=(num_tiles,),
        in_specs=[
            pl.BlockSpec((tb, D, E), lambda i, s: (i, 0, 0)),    # embeddings (per batch tile)
            pl.BlockSpec((tb, D), lambda i, s: (i, 0)),          # time_diffs
            pl.BlockSpec((tb, S), lambda i, s: (i, 0)),          # structured_data
            pl.BlockSpec((1, E), lambda i, s: (0, 0)),           # attention weight (resident)
            pl.BlockSpec((E, H1), lambda i, s: (0, 0)),          # w1e (resident)
            pl.BlockSpec((S, H1), lambda i, s: (0, 0)),          # w1s (resident)
            pl.BlockSpec((1, H1), lambda i, s: (0, 0)),          # b1
            pl.BlockSpec((H1, H2), lambda i, s: (0, 0)),         # w2
            pl.BlockSpec((1, H2), lambda i, s: (0, 0)),          # b2
            pl.BlockSpec((1, H2), lambda i, s: (0, 0)),          # w3 row
        ],
        out_specs=pl.BlockSpec((1, 1, tb), lambda i, s: (i, 0, 0)),
    )

    out = pl.pallas_call(
        _binary_classifier_kernel,
        out_shape=jax.ShapeDtypeStruct((num_tiles, 1, tb), jnp.float32),
        grid_spec=grid_spec,
        compiler_params=pltpu.CompilerParams(
            dimension_semantics=("parallel",)),
    )(scalars, emb, td, sd, params["att_w"],
      params["w1e"], params["w1s"], params["b1"],
      params["w2"], params["b2"], params["w3"])

    # (num_tiles, 1, tb) -> (B,). Matches torch .squeeze() for B > 1
    # (torch would return a 0-d scalar for B == 1).
    return out.reshape(-1)[:B]


def reference_forward(emb, td, sd, params):
    """Pure-JAX reference mirroring the PyTorch forward (eval mode, f32 math)."""
    aw = params["att_w"].astype(jnp.float32)                      # (1, E)
    norm = jnp.linalg.norm(emb, axis=2, keepdims=True)
    norm = jnp.where(norm == 0.0, jnp.ones_like(norm), norm)
    emb = emb / norm
    valid = (td != -1.0).astype(jnp.float32)[..., None]
    logits = jnp.sum(emb * aw, axis=-1, keepdims=True) + params["att_b"]
    attn = jax.nn.softmax(logits, axis=1)
    decay = jnp.exp(-jnp.maximum(td, 0.0) * params["gamma"])[..., None]
    cw = attn * decay * valid
    cw = cw / jnp.maximum(jnp.sum(cw, axis=1, keepdims=True), 1e-8)
    agg = jnp.sum(emb * cw, axis=1)
    w1e = params["w1e"].astype(jnp.float32)
    w1s = params["w1s"].astype(jnp.float32)
    w2 = params["w2"].astype(jnp.float32)
    h1 = jax.nn.relu(agg @ w1e + sd @ w1s + params["b1"])
    h2 = jax.nn.relu(h1 @ w2 + params["b2"])
    z = h2 @ params["w3"].T + params["b3"]
    return jnp.squeeze(jax.nn.sigmoid(z), axis=-1)


if __name__ == "__main__":
    B, D, E, S = 8, 4, 32, 8   # batch, num_documents, embedding_dim, structured features

    key = jax.random.PRNGKey(0)
    k_emb, k_td, k_mask, k_sd, k_par = jax.random.split(key, 5)

    document_embeddings = jax.random.normal(k_emb, (B, D, E), jnp.float32)
    raw_td = jnp.abs(jax.random.normal(k_td, (B, D), jnp.float32)) * 5.0
    invalid = jax.random.uniform(k_mask, (B, D)) < 0.25
    time_diffs = jnp.where(invalid, -1.0, raw_td).astype(jnp.float32)
    structured_data = jax.random.normal(k_sd, (B, S), jnp.float32)

    params = init_params(k_par, E, S)

    risk = binary_classification_forward(document_embeddings, time_diffs,
                                         structured_data, params)
    risk = jax.block_until_ready(risk)
    ref = reference_forward(document_embeddings, time_diffs, structured_data, params)
    assert risk.shape == (B,)
    # bf16 MXU operands + approx reciprocals -> loosened tolerance vs pure-f32 ref.
    assert jnp.allclose(risk, ref, atol=5e-3, rtol=5e-3), (risk, ref)

    # Larger, non-multiple batch to exercise the multi-tile grid + padding path.
    B2 = 300
    k2 = jax.random.split(jax.random.PRNGKey(1), 4)
    emb2 = jax.random.normal(k2[0], (B2, D, E), jnp.float32)
    td2 = jnp.where(jax.random.uniform(k2[1], (B2, D)) < 0.25, -1.0,
                    jnp.abs(jax.random.normal(k2[2], (B2, D), jnp.float32)) * 5.0
                    ).astype(jnp.float32)
    sd2 = jax.random.normal(k2[3], (B2, S), jnp.float32)
    risk2 = jax.block_until_ready(
        binary_classification_forward(emb2, td2, sd2, params))
    ref2 = reference_forward(emb2, td2, sd2, params)
    assert risk2.shape == (B2,)
    assert jnp.allclose(risk2, ref2, atol=5e-3, rtol=5e-3)

    print("KERNEL_OK")
</pallas_src>

<mosaic_0001>
module attributes {stable_mosaic.version = 11 : i64} {
  func.func @_binary_classifier_kernel(%arg0: i32, %arg1: memref<3xf32, #tpu.memory_space<smem>>, %arg2: memref<8x4x32xf32, #tpu.memory_space<vmem>>, %arg3: memref<8x4xf32, #tpu.memory_space<vmem>>, %arg4: memref<8x8xf32, #tpu.memory_space<vmem>>, %arg5: memref<1x32xf32, #tpu.memory_space<vmem>>, %arg6: memref<32x256xbf16, #tpu.memory_space<vmem>>, %arg7: memref<8x256xbf16, #tpu.memory_space<vmem>>, %arg8: memref<1x256xf32, #tpu.memory_space<vmem>>, %arg9: memref<256x64xbf16, #tpu.memory_space<vmem>>, %arg10: memref<1x64xf32, #tpu.memory_space<vmem>>, %arg11: memref<1x64xf32, #tpu.memory_space<vmem>>, %arg12: memref<1x1x8xf32, #tpu.memory_space<vmem>>) attributes {dimension_semantics = [#tpu.dimension_semantics<parallel>], iteration_bounds = array<i64: 1>, scalar_prefetch = 1 : i64, scratch_operands = 0 : i64, tpu.core_type = #tpu.core_type<tc>, window_params = [{transform_indices = @transform_0, window_bounds = array<i64: 8, 4, 32>}, {transform_indices = @transform_1, window_bounds = array<i64: 8, 4>}, {transform_indices = @transform_2, window_bounds = array<i64: 8, 8>}, {pipeline_mode = #tpu.pipeline_mode<synchronous>, transform_indices = @transform_3, window_bounds = array<i64: 1, 32>}, {pipeline_mode = #tpu.pipeline_mode<synchronous>, transform_indices = @transform_4, window_bounds = array<i64: 32, 256>}, {pipeline_mode = #tpu.pipeline_mode<synchronous>, transform_indices = @transform_5, window_bounds = array<i64: 8, 256>}, {pipeline_mode = #tpu.pipeline_mode<synchronous>, transform_indices = @transform_6, window_bounds = array<i64: 1, 256>}, {pipeline_mode = #tpu.pipeline_mode<synchronous>, transform_indices = @transform_7, window_bounds = array<i64: 256, 64>}, {pipeline_mode = #tpu.pipeline_mode<synchronous>, transform_indices = @transform_8, window_bounds = array<i64: 1, 64>}, {pipeline_mode = #tpu.pipeline_mode<synchronous>, transform_indices = @transform_9, window_bounds = array<i64: 1, 64>}, {transform_indices = @transform_10, window_bounds = array<i64: 1, 1, 8>}]} {
    %c0 = arith.constant 0 : index
    %0 = memref.load %arg1[%c0] : memref<3xf32, #tpu.memory_space<smem>>
    %c1 = arith.constant 1 : index
    %1 = memref.load %arg1[%c1] : memref<3xf32, #tpu.memory_space<smem>>
    %c2 = arith.constant 2 : index
    %2 = memref.load %arg1[%c2] : memref<3xf32, #tpu.memory_space<smem>>
    %c0_0 = arith.constant 0 : index
    %c0_1 = arith.constant 0 : index
    %3 = vector.load %arg5[%c0_0, %c0_1] : memref<1x32xf32, #tpu.memory_space<vmem>>, vector<1x32xf32>
    %c0_2 = arith.constant 0 : index
    %c0_3 = arith.constant 0 : index
    %c0_4 = arith.constant 0 : index
    %4 = vector.load %arg2[%c0_2, %c0_3, %c0_4] : memref<8x4x32xf32, #tpu.memory_space<vmem>>, vector<8x1x32xf32>
    %5 = vector.shape_cast %4 : vector<8x1x32xf32> to vector<8x32xf32>
    %6 = arith.mulf %5, %5 : vector<8x32xf32>
    %cst = arith.constant dense<0.000000e+00> : vector<8xf32>
    %7 = vector.multi_reduction <add>, %6, %cst [1] : vector<8x32xf32> to vector<8xf32>
    %8 = vector.shape_cast %7 : vector<8xf32> to vector<8x1xf32>
    %cst_5 = arith.constant 0.000000e+00 : f32
    %9 = vector.broadcast %cst_5 : f32 to vector<8x1xf32>
    %10 = arith.cmpf oeq, %8, %9 : vector<8x1xf32>
    %11 = math.rsqrt %8 : vector<8x1xf32>
    %cst_6 = arith.constant 1.000000e+00 : f32
    %12 = vector.broadcast %cst_6 : f32 to vector<8x1xf32>
    %13 = arith.select %10, %12, %11 : vector<8x1xi1>, vector<8x1xf32>
    %14 = vector.broadcast %13 : vector<8x1xf32> to vector<8x32xf32>
    %15 = arith.mulf %5, %14 : vector<8x32xf32>
    %16 = vector.broadcast %3 : vector<1x32xf32> to vector<8x32xf32>
    %17 = arith.mulf %15, %16 : vector<8x32xf32>
    %cst_7 = arith.constant dense<0.000000e+00> : vector<8xf32>
    %18 = vector.multi_reduction <add>, %17, %cst_7 [1] : vector<8x32xf32> to vector<8xf32>
    %19 = vector.shape_cast %18 : vector<8xf32> to vector<8x1xf32>
    %20 = vector.broadcast %0 : f32 to vector<8x1xf32>
    %21 = arith.addf %19, %20 : vector<8x1xf32>
    %c0_8 = arith.constant 0 : index
    %c0_9 = arith.constant 0 : index
    %22 = vector.load %arg3[%c0_8, %c0_9] : memref<8x4xf32, #tpu.memory_space<vmem>>, vector<8x1xf32>
    %cst_10 = arith.constant -1.000000e+00 : f32
    %23 = vector.broadcast %cst_10 : f32 to vector<8x1xf32>
    %24 = arith.cmpf one, %22, %23 : vector<8x1xf32>
    %25 = arith.extui %24 : vector<8x1xi1> to vector<8x1xi32>
    %26 = arith.sitofp %25 : vector<8x1xi32> to vector<8x1xf32>
    %cst_11 = arith.constant 0.000000e+00 : f32
    %27 = vector.broadcast %cst_11 : f32 to vector<8x1xf32>
    %28 = arith.maximumf %22, %27 : vector<8x1xf32>
    %cst_12 = arith.constant 0.000000e+00 : f32
    %29 = vector.broadcast %cst_12 : f32 to vector<8x1xf32>
    %30 = arith.subf %29, %28 : vector<8x1xf32>
    %31 = vector.broadcast %1 : f32 to vector<8x1xf32>
    %32 = arith.mulf %30, %31 : vector<8x1xf32>
    %33 = math.exp %32 : vector<8x1xf32>
    %34 = arith.mulf %26, %33 : vector<8x1xf32>
    %c0_13 = arith.constant 0 : index
    %c1_14 = arith.constant 1 : index
    %c0_15 = arith.constant 0 : index
    %35 = vector.load %arg2[%c0_13, %c1_14, %c0_15] : memref<8x4x32xf32, #tpu.memory_space<vmem>>, vector<8x1x32xf32>
    %36 = vector.shape_cast %35 : vector<8x1x32xf32> to vector<8x32xf32>
    %37 = arith.mulf %36, %36 : vector<8x32xf32>
    %cst_16 = arith.constant dense<0.000000e+00> : vector<8xf32>
    %38 = vector.multi_reduction <add>, %37, %cst_16 [1] : vector<8x32xf32> to vector<8xf32>
    %39 = vector.shape_cast %38 : vector<8xf32> to vector<8x1xf32>
    %cst_17 = arith.constant 0.000000e+00 : f32
    %40 = vector.broadcast %cst_17 : f32 to vector<8x1xf32>
    %41 = arith.cmpf oeq, %39, %40 : vector<8x1xf32>
    %42 = math.rsqrt %39 : vector<8x1xf32>
    %cst_18 = arith.constant 1.000000e+00 : f32
    %43 = vector.broadcast %cst_18 : f32 to vector<8x1xf32>
    %44 = arith.select %41, %43, %42 : vector<8x1xi1>, vector<8x1xf32>
    %45 = vector.broadcast %44 : vector<8x1xf32> to vector<8x32xf32>
    %46 = arith.mulf %36, %45 : vector<8x32xf32>
    %47 = vector.broadcast %3 : vector<1x32xf32> to vector<8x32xf32>
    %48 = arith.mulf %46, %47 : vector<8x32xf32>
    %cst_19 = arith.constant dense<0.000000e+00> : vector<8xf32>
    %49 = vector.multi_reduction <add>, %48, %cst_19 [1] : vector<8x32xf32> to vector<8xf32>
    %50 = vector.shape_cast %49 : vector<8xf32> to vector<8x1xf32>
    %51 = vector.broadcast %0 : f32 to vector<8x1xf32>
    %52 = arith.addf %50, %51 : vector<8x1xf32>
    %c0_20 = arith.constant 0 : index
    %c1_21 = arith.constant 1 : index
    %53 = vector.load %arg3[%c0_20, %c1_21] : memref<8x4xf32, #tpu.memory_space<vmem>>, vector<8x1xf32>
    %cst_22 = arith.constant -1.000000e+00 : f32
    %54 = vector.broadcast %cst_22 : f32 to vector<8x1xf32>
    %55 = arith.cmpf one, %53, %54 : vector<8x1xf32>
    %56 = arith.extui %55 : vector<8x1xi1> to vector<8x1xi32>
    %57 = arith.sitofp %56 : vector<8x1xi32> to vector<8x1xf32>
    %cst_23 = arith.constant 0.000000e+00 : f32
    %58 = vector.broadcast %cst_23 : f32 to vector<8x1xf32>
    %59 = arith.maximumf %53, %58 : vector<8x1xf32>
    %cst_24 = arith.constant 0.000000e+00 : f32
    %60 = vector.broadcast %cst_24 : f32 to vector<8x1xf32>
    %61 = arith.subf %60, %59 : vector<8x1xf32>
    %62 = vector.broadcast %1 : f32 to vector<8x1xf32>
    %63 = arith.mulf %61, %62 : vector<8x1xf32>
    %64 = math.exp %63 : vector<8x1xf32>
    %65 = arith.mulf %57, %64 : vector<8x1xf32>
    %c0_25 = arith.constant 0 : index
    %c2_26 = arith.constant 2 : index
    %c0_27 = arith.constant 0 : index
    %66 = vector.load %arg2[%c0_25, %c2_26, %c0_27] : memref<8x4x32xf32, #tpu.memory_space<vmem>>, vector<8x1x32xf32>
    %67 = vector.shape_cast %66 : vector<8x1x32xf32> to vector<8x32xf32>
    %68 = arith.mulf %67, %67 : vector<8x32xf32>
    %cst_28 = arith.constant dense<0.000000e+00> : vector<8xf32>
    %69 = vector.multi_reduction <add>, %68, %cst_28 [1] : vector<8x32xf32> to vector<8xf32>
    %70 = vector.shape_cast %69 : vector<8xf32> to vector<8x1xf32>
    %cst_29 = arith.constant 0.000000e+00 : f32
    %71 = vector.broadcast %cst_29 : f32 to vector<8x1xf32>
    %72 = arith.cmpf oeq, %70, %71 : vector<8x1xf32>
    %73 = math.rsqrt %70 : vector<8x1xf32>
    %cst_30 = arith.constant 1.000000e+00 : f32
    %74 = vector.broadcast %cst_30 : f32 to vector<8x1xf32>
    %75 = arith.select %72, %74, %73 : vector<8x1xi1>, vector<8x1xf32>
    %76 = vector.broadcast %75 : vector<8x1xf32> to vector<8x32xf32>
    %77 = arith.mulf %67, %76 : vector<8x32xf32>
    %78 = vector.broadcast %3 : vector<1x32xf32> to vector<8x32xf32>
    %79 = arith.mulf %77, %78 : vector<8x32xf32>
    %cst_31 = arith.constant dense<0.000000e+00> : vector<8xf32>
    %80 = vector.multi_reduction <add>, %79, %cst_31 [1] : vector<8x32xf32> to vector<8xf32>
    %81 = vector.shape_cast %80 : vector<8xf32> to vector<8x1xf32>
    %82 = vector.broadcast %0 : f32 to vector<8x1xf32>
    %83 = arith.addf %81, %82 : vector<8x1xf32>
    %c0_32 = arith.constant 0 : index
    %c2_33 = arith.constant 2 : index
    %84 = vector.load %arg3[%c0_32, %c2_33] : memref<8x4xf32, #tpu.memory_space<vmem>>, vector<8x1xf32>
    %cst_34 = arith.constant -1.000000e+00 : f32
    %85 = vector.broadcast %cst_34 : f32 to vector<8x1xf32>
    %86 = arith.cmpf one, %84, %85 : vector<8x1xf32>
    %87 = arith.extui %86 : vector<8x1xi1> to vector<8x1xi32>
    %88 = arith.sitofp %87 : vector<8x1xi32> to vector<8x1xf32>
    %cst_35 = arith.constant 0.000000e+00 : f32
    %89 = vector.broadcast %cst_35 : f32 to vector<8x1xf32>
    %90 = arith.maximumf %84, %89 : vector<8x1xf32>
    %cst_36 = arith.constant 0.000000e+00 : f32
    %91 = vector.broadcast %cst_36 : f32 to vector<8x1xf32>
    %92 = arith.subf %91, %90 : vector<8x1xf32>
    %93 = vector.broadcast %1 : f32 to vector<8x1xf32>
    %94 = arith.mulf %92, %93 : vector<8x1xf32>
    %95 = math.exp %94 : vector<8x1xf32>
    %96 = arith.mulf %88, %95 : vector<8x1xf32>
    %c0_37 = arith.constant 0 : index
    %c3 = arith.constant 3 : index
    %c0_38 = arith.constant 0 : index
    %97 = vector.load %arg2[%c0_37, %c3, %c0_38] : memref<8x4x32xf32, #tpu.memory_space<vmem>>, vector<8x1x32xf32>
    %98 = vector.shape_cast %97 : vector<8x1x32xf32> to vector<8x32xf32>
    %99 = arith.mulf %98, %98 : vector<8x32xf32>
    %cst_39 = arith.constant dense<0.000000e+00> : vector<8xf32>
    %100 = vector.multi_reduction <add>, %99, %cst_39 [1] : vector<8x32xf32> to vector<8xf32>
    %101 = vector.shape_cast %100 : vector<8xf32> to vector<8x1xf32>
    %cst_40 = arith.constant 0.000000e+00 : f32
    %102 = vector.broadcast %cst_40 : f32 to vector<8x1xf32>
    %103 = arith.cmpf oeq, %101, %102 : vector<8x1xf32>
    %104 = math.rsqrt %101 : vector<8x1xf32>
    %cst_41 = arith.constant 1.000000e+00 : f32
    %105 = vector.broadcast %cst_41 : f32 to vector<8x1xf32>
    %106 = arith.select %103, %105, %104 : vector<8x1xi1>, vector<8x1xf32>
    %107 = vector.broadcast %106 : vector<8x1xf32> to vector<8x32xf32>
    %108 = arith.mulf %98, %107 : vector<8x32xf32>
    %109 = vector.broadcast %3 : vector<1x32xf32> to vector<8x32xf32>
    %110 = arith.mulf %108, %109 : vector<8x32xf32>
    %cst_42 = arith.constant dense<0.000000e+00> : vector<8xf32>
    %111 = vector.multi_reduction <add>, %110, %cst_42 [1] : vector<8x32xf32> to vector<8xf32>
    %112 = vector.shape_cast %111 : vector<8xf32> to vector<8x1xf32>
    %113 = vector.broadcast %0 : f32 to vector<8x1xf32>
    %114 = arith.addf %112, %113 : vector<8x1xf32>
    %c0_43 = arith.constant 0 : index
    %c3_44 = arith.constant 3 : index
    %115 = vector.load %arg3[%c0_43, %c3_44] : memref<8x4xf32, #tpu.memory_space<vmem>>, vector<8x1xf32>
    %cst_45 = arith.constant -1.000000e+00 : f32
    %116 = vector.broadcast %cst_45 : f32 to vector<8x1xf32>
    %117 = arith.cmpf one, %115, %116 : vector<8x1xf32>
    %118 = arith.extui %117 : vector<8x1xi1> to vector<8x1xi32>
    %119 = arith.sitofp %118 : vector<8x1xi32> to vector<8x1xf32>
    %cst_46 = arith.constant 0.000000e+00 : f32
    %120 = vector.broadcast %cst_46 : f32 to vector<8x1xf32>
    %121 = arith.maximumf %115, %120 : vector<8x1xf32>
    %cst_47 = arith.constant 0.000000e+00 : f32
    %122 = vector.broadcast %cst_47 : f32 to vector<8x1xf32>
    %123 = arith.subf %122, %121 : vector<8x1xf32>
    %124 = vector.broadcast %1 : f32 to vector<8x1xf32>
    %125 = arith.mulf %123, %124 : vector<8x1xf32>
    %126 = math.exp %125 : vector<8x1xf32>
    %127 = arith.mulf %119, %126 : vector<8x1xf32>
    %128 = arith.maximumf %21, %52 : vector<8x1xf32>
    %129 = arith.maximumf %128, %83 : vector<8x1xf32>
    %130 = arith.maximumf %129, %114 : vector<8x1xf32>
    %131 = arith.subf %21, %130 : vector<8x1xf32>
    %132 = math.exp %131 : vector<8x1xf32>
    %133 = arith.subf %52, %130 : vector<8x1xf32>
    %134 = math.exp %133 : vector<8x1xf32>
    %135 = arith.subf %83, %130 : vector<8x1xf32>
    %136 = math.exp %135 : vector<8x1xf32>
    %137 = arith.subf %114, %130 : vector<8x1xf32>
    %138 = math.exp %137 : vector<8x1xf32>
    %139 = arith.addf %132, %134 : vector<8x1xf32>
    %140 = arith.addf %139, %136 : vector<8x1xf32>
    %141 = arith.addf %140, %138 : vector<8x1xf32>
    %142 = tpu.reciprocal %141 {approx = true} : vector<8x1xf32> -> vector<8x1xf32>
    %143 = arith.mulf %132, %142 : vector<8x1xf32>
    %144 = arith.mulf %143, %34 : vector<8x1xf32>
    %145 = arith.mulf %134, %142 : vector<8x1xf32>
    %146 = arith.mulf %145, %65 : vector<8x1xf32>
    %147 = arith.mulf %136, %142 : vector<8x1xf32>
    %148 = arith.mulf %147, %96 : vector<8x1xf32>
    %149 = arith.mulf %138, %142 : vector<8x1xf32>
    %150 = arith.mulf %149, %127 : vector<8x1xf32>
    %151 = arith.addf %144, %146 : vector<8x1xf32>
    %152 = arith.addf %151, %148 : vector<8x1xf32>
    %153 = arith.addf %152, %150 : vector<8x1xf32>
    %cst_48 = arith.constant 9.99999993E-9 : f32
    %154 = vector.broadcast %cst_48 : f32 to vector<8x1xf32>
    %155 = arith.maximumf %153, %154 : vector<8x1xf32>
    %156 = tpu.reciprocal %155 {approx = true} : vector<8x1xf32> -> vector<8x1xf32>
    %157 = vector.broadcast %144 : vector<8x1xf32> to vector<8x32xf32>
    %158 = arith.mulf %157, %15 : vector<8x32xf32>
    %159 = vector.broadcast %146 : vector<8x1xf32> to vector<8x32xf32>
    %160 = arith.mulf %159, %46 : vector<8x32xf32>
    %161 = arith.addf %158, %160 : vector<8x32xf32>
    %162 = vector.broadcast %148 : vector<8x1xf32> to vector<8x32xf32>
    %163 = arith.mulf %162, %77 : vector<8x32xf32>
    %164 = arith.addf %161, %163 : vector<8x32xf32>
    %165 = vector.broadcast %150 : vector<8x1xf32> to vector<8x32xf32>
    %166 = arith.mulf %165, %108 : vector<8x32xf32>
    %167 = arith.addf %164, %166 : vector<8x32xf32>
    %168 = vector.broadcast %156 : vector<8x1xf32> to vector<8x32xf32>
    %169 = arith.mulf %167, %168 : vector<8x32xf32>
    %170 = arith.truncf %169 : vector<8x32xf32> to vector<8x32xbf16>
    %c0_49 = arith.constant 0 : index
    %c0_50 = arith.constant 0 : index
    %171 = vector.load %arg6[%c0_49, %c0_50] : memref<32x256xbf16, #tpu.memory_space<vmem>>, vector<32x256xbf16>
    %cst_51 = arith.constant dense<0.000000e+00> : vector<8x256xf32>
    %172 = tpu.matmul %170, %171, %cst_51 {dimension_numbers = #tpu.dot_dimension_numbers<[1], [0], [0], [1], [0, 0, 1, 1], [], []>} : vector<8x32xbf16>, vector<32x256xbf16>, vector<8x256xf32> -> vector<8x256xf32>
    %c0_52 = arith.constant 0 : index
    %c0_53 = arith.constant 0 : index
    %173 = vector.load %arg4[%c0_52, %c0_53] : memref<8x8xf32, #tpu.memory_space<vmem>>, vector<8x8xf32>
    %174 = arith.truncf %173 : vector<8x8xf32> to vector<8x8xbf16>
    %c0_54 = arith.constant 0 : index
    %c0_55 = arith.constant 0 : index
    %175 = vector.load %arg7[%c0_54, %c0_55] : memref<8x256xbf16, #tpu.memory_space<vmem>>, vector<8x256xbf16>
    %cst_56 = arith.constant dense<0.000000e+00> : vector<8x256xf32>
    %176 = tpu.matmul %174, %175, %cst_56 {dimension_numbers = #tpu.dot_dimension_numbers<[1], [0], [0], [1], [0, 0, 1, 1], [], []>} : vector<8x8xbf16>, vector<8x256xbf16>, vector<8x256xf32> -> vector<8x256xf32>
    %177 = arith.addf %172, %176 : vector<8x256xf32>
    %c0_57 = arith.constant 0 : index
    %c0_58 = arith.constant 0 : index
    %178 = vector.load %arg8[%c0_57, %c0_58] : memref<1x256xf32, #tpu.memory_space<vmem>>, vector<1x256xf32>
    %179 = vector.broadcast %178 : vector<1x256xf32> to vector<8x256xf32>
    %180 = arith.addf %177, %179 : vector<8x256xf32>
    %cst_59 = arith.constant 0.000000e+00 : f32
    %181 = vector.broadcast %cst_59 : f32 to vector<8x256xf32>
    %182 = arith.maximumf %180, %181 : vector<8x256xf32>
    %183 = arith.truncf %182 : vector<8x256xf32> to vector<8x256xbf16>
    %c0_60 = arith.constant 0 : index
    %c0_61 = arith.constant 0 : index
    %184 = vector.load %arg9[%c0_60, %c0_61] : memref<256x64xbf16, #tpu.memory_space<vmem>>, vector<256x64xbf16>
    %cst_62 = arith.constant dense<0.000000e+00> : vector<8x64xf32>
    %185 = tpu.matmul %183, %184, %cst_62 {dimension_numbers = #tpu.dot_dimension_numbers<[1], [0], [0], [1], [0, 0, 1, 1], [], []>} : vector<8x256xbf16>, vector<256x64xbf16>, vector<8x64xf32> -> vector<8x64xf32>
    %c0_63 = arith.constant 0 : index
    %c0_64 = arith.constant 0 : index
    %186 = vector.load %arg10[%c0_63, %c0_64] : memref<1x64xf32, #tpu.memory_space<vmem>>, vector<1x64xf32>
    %187 = vector.broadcast %186 : vector<1x64xf32> to vector<8x64xf32>
    %188 = arith.addf %185, %187 : vector<8x64xf32>
    %cst_65 = arith.constant 0.000000e+00 : f32
    %189 = vector.broadcast %cst_65 : f32 to vector<8x64xf32>
    %190 = arith.maximumf %188, %189 : vector<8x64xf32>
    %c0_66 = arith.constant 0 : index
    %c0_67 = arith.constant 0 : index
    %191 = vector.load %arg11[%c0_66, %c0_67] : memref<1x64xf32, #tpu.memory_space<vmem>>, vector<1x64xf32>
    %cst_68 = arith.constant dense<0.000000e+00> : vector<1x8xf32>
    %192 = tpu.matmul %191, %190, %cst_68 {dimension_numbers = #tpu.dot_dimension_numbers<[1], [1], [0], [0], [0, 0, 1, 0], [], []>} : vector<1x64xf32>, vector<8x64xf32>, vector<1x8xf32> -> vector<1x8xf32>
    %193 = vector.broadcast %2 : f32 to vector<1x8xf32>
    %194 = arith.addf %192, %193 : vector<1x8xf32>
    %195 = arith.negf %194 : vector<1x8xf32>
    %196 = math.exp %195 : vector<1x8xf32>
    %cst_69 = arith.constant 1.000000e+00 : f32
    %197 = vector.broadcast %cst_69 : f32 to vector<1x8xf32>
    %198 = arith.addf %197, %196 : vector<1x8xf32>
    %199 = arith.divf %197, %198 : vector<1x8xf32>
    %c0_70 = arith.constant 0 : index
    %c0_71 = arith.constant 0 : index
    %c0_72 = arith.constant 0 : index
    %200 = vector.load %arg12[%c0_70, %c0_71, %c0_72] : memref<1x1x8xf32, #tpu.memory_space<vmem>>, vector<1x1x8xf32>
    %201 = vector.shape_cast %200 : vector<1x1x8xf32> to vector<1x8xf32>
    %202 = vector.shape_cast %199 : vector<1x8xf32> to vector<1x1x8xf32>
    tpu.vector_store %arg12[%c0_70, %c0_71, %c0_72], %202 {strides = array<i32>} : memref<1x1x8xf32, #tpu.memory_space<vmem>>, vector<1x1x8xf32>,
    return
  }
  func.func @transform_0(%arg0: i32, %arg1: memref<3xf32, #tpu.memory_space<smem>>) -> (i32, i32, i32) {
    %c0_i32 = arith.constant 0 : i32
    %c0_i32_0 = arith.constant 0 : i32
    %c0_i32_1 = arith.constant 0 : i32
    return %arg0, %c0_i32, %c0_i32_0 : i32, i32, i32
  }
  func.func @transform_1(%arg0: i32, %arg1: memref<3xf32, #tpu.memory_space<smem>>) -> (i32, i32) {
    %c0_i32 = arith.constant 0 : i32
    %c0_i32_0 = arith.constant 0 : i32
    return %arg0, %c0_i32 : i32, i32
  }
  func.func @transform_2(%arg0: i32, %arg1: memref<3xf32, #tpu.memory_space<smem>>) -> (i32, i32) {
    %c0_i32 = arith.constant 0 : i32
    %c0_i32_0 = arith.constant 0 : i32
    return %arg0, %c0_i32 : i32, i32
  }
  func.func @transform_3(%arg0: i32, %arg1: memref<3xf32, #tpu.memory_space<smem>>) -> (i32, i32) {
    %c0_i32 = arith.constant 0 : i32
    %c0_i32_0 = arith.constant 0 : i32
    %c0_i32_1 = arith.constant 0 : i32
    return %c0_i32, %c0_i32_0 : i32, i32
  }
  func.func @transform_4(%arg0: i32, %arg1: memref<3xf32, #tpu.memory_space<smem>>) -> (i32, i32) {
    %c0_i32 = arith.constant 0 : i32
    %c0_i32_0 = arith.constant 0 : i32
    %c0_i32_1 = arith.constant 0 : i32
    return %c0_i32, %c0_i32_0 : i32, i32
  }
  func.func @transform_5(%arg0: i32, %arg1: memref<3xf32, #tpu.memory_space<smem>>) -> (i32, i32) {
    %c0_i32 = arith.constant 0 : i32
    %c0_i32_0 = arith.constant 0 : i32
    %c0_i32_1 = arith.constant 0 : i32
    return %c0_i32, %c0_i32_0 : i32, i32
  }
  func.func @transform_6(%arg0: i32, %arg1: memref<3xf32, #tpu.memory_space<smem>>) -> (i32, i32) {
    %c0_i32 = arith.constant 0 : i32
    %c0_i32_0 = arith.constant 0 : i32
    %c0_i32_1 = arith.constant 0 : i32
    return %c0_i32, %c0_i32_0 : i32, i32
  }
  func.func @transform_7(%arg0: i32, %arg1: memref<3xf32, #tpu.memory_space<smem>>) -> (i32, i32) {
    %c0_i32 = arith.constant 0 : i32
    %c0_i32_0 = arith.constant 0 : i32
    %c0_i32_1 = arith.constant 0 : i32
    return %c0_i32, %c0_i32_0 : i32, i32
  }
  func.func @transform_8(%arg0: i32, %arg1: memref<3xf32, #tpu.memory_space<smem>>) -> (i32, i32) {
    %c0_i32 = arith.constant 0 : i32
    %c0_i32_0 = arith.constant 0 : i32
    %c0_i32_1 = arith.constant 0 : i32
    return %c0_i32, %c0_i32_0 : i32, i32
  }
  func.func @transform_9(%arg0: i32, %arg1: memref<3xf32, #tpu.memory_space<smem>>) -> (i32, i32) {
    %c0_i32 = arith.constant 0 : i32
    %c0_i32_0 = arith.constant 0 : i32
    %c0_i32_1 = arith.constant 0 : i32
    return %c0_i32, %c0_i32_0 : i32, i32
  }
  func.func @transform_10(%arg0: i32, %arg1: memref<3xf32, #tpu.memory_space<smem>>) -> (i32, i32, i32) {
    %c0_i32 = arith.constant 0 : i32
    %c0_i32_0 = arith.constant 0 : i32
    %c0_i32_1 = arith.constant 0 : i32
    return %arg0, %c0_i32, %c0_i32_0 : i32, i32, i32
  }
}

</mosaic_0001>

<bundles_post_ra>
// kernel: tpu_custom_call.1
= control target key start
LH: loop header
LB: loop body
LE: loop exit
PB: predicated region body
PF: predicated region fallthrough
CT: control target
= control target key end

     0   :  { %s1978_s0 = inlined_call_operand.vmem [shape: f32[3], index: 0, kind: input, shape index: {}]   ;;  %s1979_s1 = inlined_call_operand.vmem [shape: f32[8,4,32], index: 1, kind: input, shape index: {}]   ;;  %s1980_s2 = inlined_call_operand.vmem [shape: f32[8,4], index: 2, kind: input, shape index: {}]   ;;  %s1981_s3 = inlined_call_operand.vmem [shape: f32[8,8], index: 3, kind: input, shape index: {}]   ;;  %s1982_s4 = inlined_call_operand.vmem [shape: f32[1,32], index: 4, kind: input, shape index: {}]   ;;  %s1983_s5 = inlined_call_operand.vmem [shape: bf16[32,256], index: 5, kind: input, shape index: {}]   ;;  %s1984_s6 = inlined_call_operand.vmem [shape: bf16[8,256], index: 6, kind: input, shape index: {}]   ;;  %s1985_s7 = inlined_call_operand.vmem [shape: f32[1,256], index: 7, kind: input, shape index: {}]   ;;  %s1986_s8 = inlined_call_operand.vmem [shape: bf16[256,64], index: 8, kind: input, shape index: {}]   ;;  %s1987_s9 = inlined_call_operand.vmem [shape: f32[1,64], index: 9, kind: input, shape index: {}]   ;;  %s1988_s10 = inlined_call_operand.vmem [shape: f32[1,64], index: 10, kind: input, shape index: {}]   ;;  %s1989_s11 = inlined_call_operand.hbm [shape: f32[1,1,8], index: 11, kind: output, shape index: {}]  }
   0x1   :  { %s16_s19 = sshll.u32 %s1978_s0, 4  ;;  %s17_s19 = int_to_ptr.vmem [resolvable:$true] %s16_s19 }
   0x2   :  { %s1208_s20 = scalar_lea.vmem %s17_s19, 16  ;;  %p1213_p1 = scmp.lt.s32.totalorder %s17_s19, %s17_s19 }
   0x3   :  { %p1209_p0 = scmp.ne.s32.totalorder %s17_s19, %s1208_s20  ;;  %p1214_p2 = scmp.lt.s32.totalorder %s1208_s20, %s1208_s20 }
   0x5   :  { %p1215_p3 = por %p1214_p2, %p1213_p1 }
   0x7   :  { %p1216_p4 = pnand %p1215_p3, %p1209_p0 }
   0x9   :  { %1219 = shalt.err (!%p1216_p4)  }
   0xa   :  { %s1246_s21 = smov [#allocation3]  }
   0xb   :  { %19 = dma.vmem_to_smem %s17_s19, 16, %s1246_s21, [#allocation2] }
   0xc   :  { %1242 = dma.done.wait [#allocation2], 16 }
   0xd   :  { %1243 = vsyncadd [#allocation2], 4294967280 }
   0xe   :  { %21 = sfence }
   0xf   :  { %vm73_vm0 = vcmask 1041409   ;;  %vm76_vm1 = vcmask 1042434   ;;  %vm79_vm2 = vcmask 1043459   ;;  %v1323_v0 = vld [vmem:[%s1979_s1 + $0x2] sm:$0x1]  ;;  %vm82_vm3 = vcmask 1044484  }
  0x10   :  { %vm85_vm4 = vcmask 1045509   ;;  %vm88_vm5 = vcmask 1046534   ;;  %vm91_vm6 = vcmask 1047559   ;;  %v1328_v1 = vld [vmem:[%s1979_s1 + $0x6] sm:$0x1]  ;;  %vm94_vm7 = vcmask 261120  }
  0x11   :  { %v1333_v2 = vld [vmem:[%s1979_s1 + $0xa] sm:$0x1]  ;;  %v1338_v3 = vld [vmem:[%s1979_s1 + $0xe] sm:$0x1]  ;;  %v1343_v4 = vld [vmem:[%s1979_s1 + $0x12] sm:$0x1]  ;;  %v290_v5 = vmul.f32 %v1323_v0, %v1323_v0  ;;  %v291_v6 = vmul.f32 %v1328_v1, %v1328_v1 }
  0x12   :  { %v1352_v7 = vld [vmem:[%s1979_s1 + $0x16] sm:$0x1]  ;;  %v1357_v8 = vld [vmem:[%s1979_s1 + $0x1a] sm:$0x1]  ;;  %v1362_v9 = vld [vmem:[%s1979_s1 + $0x1e] sm:$0x1]  ;;  %v292_v10 = vmul.f32 %v1333_v2, %v1333_v2  ;;  %v293_v11 = vmul.f32 %v1338_v3, %v1338_v3  ;;  %v294_v12 = vmul.f32 %v1343_v4, %v1343_v4 }
  0x13   :  { %v295_v13 = vmul.f32 %v1352_v7, %v1352_v7  ;;  %v296_v14 = vmul.f32 %v1357_v8, %v1357_v8  ;;  %v297_v15 = vmul.f32 %v1362_v9, %v1362_v9  ;;  %v306_v16 = vrot.slane %v291_v6, 7  ;;  %v1379_v17 = vld [vmem:[%s1979_s1] sm:$0x1]  ;;  %v1384_v18 = vld [vmem:[%s1979_s1 + $0x4] sm:$0x1] }
  0x14   :  { %v308_v19 = vrot.slane %v292_v10, 6  ;;  %v310_v20 = vrot.slane %v293_v11, 5  ;;  %v312_v21 = vrot.slane %v294_v12, 4  ;;  %v1389_v22 = vld [vmem:[%s1979_s1 + $0x8] sm:$0x1]  ;;  %v56_v23 = vmul.f32 %v1379_v17, %v1379_v17 }
  0x15   :  { %v307_v24 = vsel %vm73_vm0, %v306_v16, %v290_v5  ;;  %v314_v25 = vrot.slane %v295_v13, 3  ;;  %v316_v26 = vrot.slane %v296_v14, 2  ;;  %v318_v27 = vrot.slane %v297_v15, 1  ;;  %v1397_v28 = vld [vmem:[%s1979_s1 + $0xc] sm:$0x1] }
  0x16   :  { %v309_v29 = vsel %vm76_vm1, %v308_v19, %v307_v24  ;;  %v1403_v30 = vld [vmem:[%s1979_s1 + $0x10] sm:$0x1]  ;;  %v1408_v31 = vld [vmem:[%s1979_s1 + $0x14] sm:$0x1]  ;;  %v1413_v32 = vld [vmem:[%s1979_s1 + $0x18] sm:$0x1]  ;;  %v57_v33 = vmul.f32 %v1384_v18, %v1384_v18  ;;  %v58_v34 = vmul.f32 %v1389_v22, %v1389_v22  ;;  %v59_v35 = vmul.f32 %v1397_v28, %v1397_v28 }
  0x17   :  { %v311_v36 = vsel %vm79_vm2, %v310_v20, %v309_v29  ;;  %v1425_v37 = vld [vmem:[%s1979_s1 + $0x1c] sm:$0x1]  ;;  %v60_v38 = vmul.f32 %v1403_v30, %v1403_v30  ;;  %v61_v39 = vmul.f32 %v1408_v31, %v1408_v31  ;;  %v62_v40 = vmul.f32 %v1413_v32, %v1413_v32  ;;  %v1436_v41 = vld [vmem:[%s1979_s1 + $0x3] sm:$0x1]  ;;  %v1441_v42 = vld [vmem:[%s1979_s1 + $0x7] sm:$0x1] }
  0x18   :  { %v313_v43 = vsel %vm82_vm3, %v312_v21, %v311_v36  ;;  %v63_v44 = vmul.f32 %v1425_v37, %v1425_v37  ;;  %v72_v45 = vrot.slane %v57_v33, 7  ;;  %v75_v46 = vrot.slane %v58_v34, 6  ;;  %v1449_v47 = vld [vmem:[%s1979_s1 + $0xb] sm:$0x1]  ;;  %v1454_v48 = vld [vmem:[%s1979_s1 + $0xf] sm:$0x1] }
  0x19   :  { %v315_v49 = vsel %vm85_vm4, %v314_v25, %v313_v43  ;;  %v78_v50 = vrot.slane %v59_v35, 5  ;;  %v81_v51 = vrot.slane %v60_v38, 4  ;;  %v84_v52 = vrot.slane %v61_v39, 3  ;;  %v1460_v53 = vld [vmem:[%s1979_s1 + $0x13] sm:$0x1] }
  0x1a   :  { %v317_v54 = vsel %vm88_vm5, %v316_v26, %v315_v49  ;;  %v74_v55 = vsel %vm73_vm0, %v72_v45, %v56_v23  ;;  %v87_v56 = vrot.slane %v62_v40, 2  ;;  %v90_v57 = vrot.slane %v63_v44, 1  ;;  %v1467_v58 = vld [vmem:[%s1979_s1 + $0x17] sm:$0x1]  ;;  %v1472_v59 = vld [vmem:[%s1979_s1 + $0x1b] sm:$0x1] }
  0x1b   :  { %v319_v60 = vsel %vm91_vm6, %v318_v27, %v317_v54  ;;  %v77_v61 = vsel %vm76_vm1, %v75_v46, %v74_v55  ;;  %v1479_v62 = vld [vmem:[%s1979_s1 + $0x1f] sm:$0x1]  ;;  %v394_v63 = vmul.f32 %v1436_v41, %v1436_v41  ;;  %v395_v5 = vmul.f32 %v1441_v42, %v1441_v42  ;;  %v1494_v13 = vld [vmem:[%s1979_s1 + $0x1] sm:$0x1]  ;;  %v1499_v14 = vld [vmem:[%s1979_s1 + $0x5] sm:$0x1] }
  0x1c   :  { %v321_v6 = vsel %vm94_vm7, %v319_v60, 0.0  ;;  %v80_v10 = vsel %vm79_vm2, %v78_v50, %v77_v61  ;;  %v396_v11 = vmul.f32 %v1449_v47, %v1449_v47  ;;  %v397_v12 = vmul.f32 %v1454_v48, %v1454_v48  ;;  %v1511_v21 = vld [vmem:[%s1979_s1 + $0x9] sm:$0x1]  ;;  %v1516_v23 = vld [vmem:[%s1979_s1 + $0xd] sm:$0x1] }
  0x1d   :  { %322 = vadd.xlane.f32.xlu1 %v321_v6  ;;  %v83_v15 = vsel %vm82_vm3, %v81_v51, %v80_v10  ;;  %v398_v16 = vmul.f32 %v1460_v53, %v1460_v53  ;;  %v399_v19 = vmul.f32 %v1467_v58, %v1467_v58  ;;  %v400_v20 = vmul.f32 %v1472_v59, %v1472_v59  ;;  %v1521_v24 = vld [vmem:[%s1979_s1 + $0x11] sm:$0x1]  ;;  %v1529_v33 = vld [vmem:[%s1979_s1 + $0x15] sm:$0x1]  ;;  %v1534_v34 = vld [vmem:[%s1979_s1 + $0x19] sm:$0x1] }
  0x1e   :  { %v86_v25 = vsel %vm85_vm4, %v84_v52, %v83_v15  ;;  %v401_v26 = vmul.f32 %v1479_v62, %v1479_v62  ;;  %v410_v27 = vrot.slane %v395_v5, 7  ;;  %v412_v29 = vrot.slane %v396_v11, 6  ;;  %v1539_v35 = vld [vmem:[%s1979_s1 + $0x1d] sm:$0x1] }
  0x1f   :  { %v89_v36 = vsel %vm88_vm5, %v87_v56, %v86_v25  ;;  %v414_v38 = vrot.slane %v397_v12, 5  ;;  %v416_v39 = vrot.slane %v398_v16, 4  ;;  %v418_v40 = vrot.slane %v399_v19, 3 }
  0x20   :  { %v92_v43 = vsel %vm91_vm6, %v90_v57, %v89_v36  ;;  %v411_v44 = vsel %vm73_vm0, %v410_v27, %v394_v63  ;;  %v420_v45 = vrot.slane %v400_v20, 2  ;;  %v422_v46 = vrot.slane %v401_v26, 1 }
  0x21   :  { %v95_v49 = vsel %vm94_vm7, %v92_v43, 0.0  ;;  %v413_v50 = vsel %vm76_vm1, %v412_v29, %v411_v44  ;;  %v186_v51 = vmul.f32 %v1494_v13, %v1494_v13  ;;  %v187_v52 = vmul.f32 %v1499_v14, %v1499_v14 }
  0x22   :  { %96 = vadd.xlane.f32.xlu0 %v95_v49  ;;  %v415_v54 = vsel %vm79_vm2, %v414_v38, %v413_v50  ;;  %v188_v55 = vmul.f32 %v1511_v21, %v1511_v21  ;;  %v189_v56 = vmul.f32 %v1516_v23, %v1516_v23  ;;  %v190_v57 = vmul.f32 %v1521_v24, %v1521_v24 }
  0x23   :  { %v417_v60 = vsel %vm82_vm3, %v416_v39, %v415_v54  ;;  %v191_v61 = vmul.f32 %v1529_v33, %v1529_v33  ;;  %v192_v63 = vmul.f32 %v1534_v34, %v1534_v34  ;;  %v193_v5 = vmul.f32 %v1539_v35, %v1539_v35 }
  0x24   :  { %v419_v6 = vsel %vm85_vm4, %v418_v40, %v417_v60  ;;  %v202_v10 = vrot.slane %v187_v52, 7  ;;  %v204_v11 = vrot.slane %v188_v55, 6  ;;  %v206_v12 = vrot.slane %v189_v56, 5 }
  0x25   :  { %v421_v15 = vsel %vm88_vm5, %v420_v45, %v419_v6  ;;  %v208_v16 = vrot.slane %v190_v57, 4  ;;  %v210_v25 = vrot.slane %v191_v61, 3  ;;  %v212_v26 = vrot.slane %v192_v63, 2 }
  0x26   :  { %v423_v19 = vsel %vm91_vm6, %v422_v46, %v421_v15  ;;  %v203_v20 = vsel %vm73_vm0, %v202_v10, %v186_v51  ;;  %v214_v36 = vrot.slane %v193_v5, 1 }
  0x27   :  { %v425_v27 = vsel %vm94_vm7, %v423_v19, 0.0  ;;  %v205_v29 = vsel %vm76_vm1, %v204_v11, %v203_v20 }
  0x28   :  { %426 = vadd.xlane.f32.xlu1 %v425_v27  ;;  %v207_v38 = vsel %vm79_vm2, %v206_v12, %v205_v29 }
  0x29   :  { %v209_v39 = vsel %vm82_vm3, %v208_v16, %v207_v38 }
  0x2a   :  { %v211_v40 = vsel %vm85_vm4, %v210_v25, %v209_v39 }
  0x2b   :  { %v213_v43 = vsel %vm88_vm5, %v212_v26, %v211_v40 }
  0x2c   :  { %v215_v44 = vsel %vm91_vm6, %v214_v36, %v213_v43 }
  0x2d   :  { %22 = vsyncpa [#allocation5], 0  ;;  %v217_v45 = vsel %vm94_vm7, %v215_v44, 0.0  ;;  %v1582_v60 = vld [vmem:[%s1982_s4] ss:$0 sm:$0xff]  ;;  %s44_s4 = sld [smem:[#allocation3]] }
  0x2e   :  { %218 = vadd.xlane.f32.xlu0 %v217_v45  ;;  %s1080_s26 = sld [smem:[#allocation3 + $0x1]]  ;;  %s1251_s29 = smov 127   ;;  %vm673_vm13 = vcmask 1043456   ;;  %vm669_vm14 = vcmask 64512   ;;  %vm1255_vm15 = vmmov 0  }
  0x2f   :  { %s1252_s30 = smov 125   ;;  %s1081_s28 = sld [smem:[#allocation3 + $0x2]] }
  0xaa   :  { %v323_v46 = vpop.xlane.xlu1 %322 }
  0xab   :  { %1182 = vrsqrt.f32 %v323_v46  ;;  %vm324_vm8 = vcmp.eq.f32.partialorder %v323_v46, 0.0 }
  0xaf   :  { %v97_v49 = vpop.xlane.xlu0 %96 }
  0xb0   :  { %1184 = vrsqrt.f32 %v97_v49  ;;  %vm98_vm9 = vcmp.eq.f32.partialorder %v97_v49, 0.0 }
  0xb5   :  { %v1183_v50 = vpop.eup %1182  ;;  %v427_v51 = vpop.xlane.xlu1 %426 }
  0xb6   :  { %v326_v52 = vsel %vm324_vm8, 1.0, %v1183_v50  ;;  %1186 = vrsqrt.f32 %v427_v51  ;;  %vm428_vm10 = vcmp.eq.f32.partialorder %v427_v51, 0.0 }
  0xb7   :  { %v328_v54 = vrot.slane %v326_v52, 1  ;;  %v329_v55 = vrot.slane %v326_v52, 2  ;;  %v330_v56 = vrot.slane %v326_v52, 3  ;;  %v1577_v57 = vmul.f32 %v326_v52, %v1323_v0 }
  0xb8   :  { %v331_v61 = vrot.slane %v326_v52, 4  ;;  %v332_v63 = vrot.slane %v326_v52, 5  ;;  %v333_v5 = vrot.slane %v326_v52, 6  ;;  %v334_v6 = vrot.slane %v326_v52, 7 }
  0xb9   :  { %v1585_v10 = vmul.f32 %v328_v54, %v1328_v1  ;;  %v1588_v11 = vmul.f32 %v329_v55, %v1333_v2  ;;  %v1591_v12 = vmul.f32 %v330_v56, %v1338_v3  ;;  %v1604_v1 = vmul.f32 %v1582_v60, %v1577_v57 }
  0xba   :  { %v1185_v0 = vpop.eup %1184  ;;  %v1594_v15 = vmul.f32 %v331_v61, %v1343_v4  ;;  %v1597_v16 = vmul.f32 %v332_v63, %v1352_v7  ;;  %v1600_v19 = vmul.f32 %v333_v5, %v1357_v8  ;;  %v1608_v3 = vmul.f32 %v334_v6, %v1362_v9 }
  0xbb   :  { %v100_v2 = vsel %vm98_vm9, 1.0, %v1185_v0  ;;  %v219_v20 = vpop.xlane.xlu0 %218  ;;  %v1612_v4 = vmul.f32 %v1582_v60, %v1585_v10  ;;  %v1616_v7 = vmul.f32 %v1582_v60, %v1588_v11  ;;  %v1623_v9 = vmul.f32 %v1582_v60, %v1591_v12 }
  0xbc   :  { %v102_v8 = vrot.slane %v100_v2, 1  ;;  %v103_v25 = vrot.slane %v100_v2, 2  ;;  %v104_v26 = vrot.slane %v100_v2, 3  ;;  %v1619_v27 = vmul.f32 %v100_v2, %v1379_v17 }
  0xbd   :  { %1188 = vrsqrt.f32 %v219_v20  ;;  %v105_v29 = vrot.slane %v100_v2, 4  ;;  %v106_v36 = vrot.slane %v100_v2, 5  ;;  %v107_v39 = vrot.slane %v100_v2, 6 }
  0xbe   :  { %v1626_v38 = vmul.f32 %v102_v8, %v1384_v18  ;;  %v108_v40 = vrot.slane %v100_v2, 7  ;;  %v1629_v43 = vmul.f32 %v103_v25, %v1389_v22  ;;  %vm220_vm11 = vcmp.eq.f32.partialorder %v219_v20, 0.0 }
  0xbf   :  { %v1632_v44 = vmul.f32 %v104_v26, %v1397_v28  ;;  %v1635_v17 = vmul.f32 %v105_v29, %v1403_v30  ;;  %v1638_v45 = vmul.f32 %v106_v36, %v1408_v31  ;;  %v131_v46 = vmul.f32 %v1582_v60, %v1619_v27 }
  0xc0   :  { %v1187_v18 = vpop.eup %1186  ;;  %v1643_v49 = vmul.f32 %v107_v39, %v1413_v32  ;;  %v1646_v22 = vmul.f32 %v108_v40, %v1425_v37  ;;  %v132_v28 = vmul.f32 %v1582_v60, %v1626_v38  ;;  %v133_v30 = vmul.f32 %v1582_v60, %v1629_v43 }
  0xc1   :  { %v1653_v50 = vsel %vm428_vm10, 1.0, %v1187_v18  ;;  %v134_v31 = vmul.f32 %v1582_v60, %v1632_v44  ;;  %v135_v52 = vmul.f32 %v1582_v60, %v1635_v17  ;;  %v136_v32 = vmul.f32 %v1582_v60, %v1638_v45 }
  0xc2   :  { %v432_v37 = vrot.slane %v1653_v50, 1  ;;  %v1666_v51 = vmul.f32 %v1653_v50, %v1436_v41  ;;  %v137_v56 = vmul.f32 %v1582_v60, %v1643_v49  ;;  %v138_v61 = vmul.f32 %v1582_v60, %v1646_v22 }
  0xc3   :  { %v147_v63 = vrot.slane %v132_v28, 7  ;;  %v149_v5 = vrot.slane %v133_v30, 6  ;;  %v151_v0 = vrot.slane %v134_v31, 5  ;;  %v153_v2 = vrot.slane %v135_v52, 4 }
  0xc4   :  { %v1673_v6 = vmul.f32 %v432_v37, %v1441_v42  ;;  %v155_v8 = vrot.slane %v136_v32, 3  ;;  %v157_v26 = vrot.slane %v137_v56, 2  ;;  %v159_v29 = vrot.slane %v138_v61, 1 }
  0xc5   :  { %v148_v25 = vsel %vm73_vm0, %v147_v63, %v131_v46  ;;  %v355_v41 = vmul.f32 %v1582_v60, %v1594_v15  ;;  %v356_v39 = vmul.f32 %v1582_v60, %v1597_v16  ;;  %v1683_v40 = vmul.f32 %v1582_v60, %v1600_v19 }
  0xc6   :  { %v150_v36 = vsel %vm76_vm1, %v149_v5, %v148_v25  ;;  %v1687_v42 = vmul.f32 %v1582_v60, %v1608_v3  ;;  %v367_v28 = vrot.slane %v1612_v4, 7  ;;  %v369_v30 = vrot.slane %v1616_v7, 6 }
  0xc7   :  { %v1189_v18 = vpop.eup %1188  ;;  %v152_v46 = vsel %vm79_vm2, %v151_v0, %v150_v36  ;;  %v371_v31 = vrot.slane %v1623_v9, 5  ;;  %v373_v37 = vrot.slane %v355_v41, 4  ;;  %v375_v56 = vrot.slane %v356_v39, 3 }
  0xc8   :  { %v222_v52 = vsel %vm220_vm11, 1.0, %v1189_v18  ;;  %v154_v32 = vsel %vm82_vm3, %v153_v2, %v152_v46  ;;  %v368_v46 = vsel %vm73_vm0, %v367_v28, %v1604_v1  ;;  %v435_v28 = vrot.slane %v1653_v50, 4 }
  0xc9   :  { %v224_v61 = vrot.slane %v222_v52, 1  ;;  %v225_v63 = vrot.slane %v222_v52, 2  ;;  %v226_v5 = vrot.slane %v222_v52, 3  ;;  %v1696_v25 = vmul.f32 %v222_v52, %v1494_v13 }
  0xca   :  { %v156_v0 = vsel %vm85_vm4, %v155_v8, %v154_v32  ;;  %v227_v36 = vrot.slane %v222_v52, 4  ;;  %v228_v4 = vrot.slane %v222_v52, 5  ;;  %v229_v55 = vrot.slane %v222_v52, 6 }
  0xcb   :  { %v1700_v7 = vmul.f32 %v224_v61, %v1499_v14  ;;  %v158_v20 = vsel %vm88_vm5, %v157_v26, %v156_v0  ;;  %v230_v9 = vrot.slane %v222_v52, 7  ;;  %v1704_v2 = vmul.f32 %v225_v63, %v1511_v21 }
  0xcc   :  { %v160_v41 = vsel %vm91_vm6, %v159_v29, %v158_v20  ;;  %v1708_v39 = vmul.f32 %v226_v5, %v1516_v23  ;;  %v1711_v13 = vmul.f32 %v227_v36, %v1521_v24  ;;  %v1714_v8 = vmul.f32 %v228_v4, %v1529_v33 }
  0xcd   :  { %v162_v14 = vsel %vm94_vm7, %v160_v41, 0.0  ;;  %v1718_v18 = vmul.f32 %v229_v55, %v1534_v34  ;;  %v1721_v26 = vmul.f32 %v230_v9, %v1539_v35  ;;  %v247_v21 = vmul.f32 %v1582_v60, %v1696_v25 }
  0xce   :  { %163 = vadd.xlane.f32.xlu0 %v162_v14  ;;  %v248_v23 = vmul.f32 %v1582_v60, %v1700_v7  ;;  %v249_v24 = vmul.f32 %v1582_v60, %v1704_v2  ;;  %v250_v33 = vmul.f32 %v1582_v60, %v1708_v39  ;;  %v251_v34 = vmul.f32 %v1582_v60, %v1711_v13 }
  0xcf   :  { %v252_v35 = vmul.f32 %v1582_v60, %v1714_v8  ;;  %v253_v55 = vmul.f32 %v1582_v60, %v1718_v18  ;;  %v254_v29 = vmul.f32 %v1582_v60, %v1721_v26  ;;  %v370_v4 = vsel %vm76_vm1, %v369_v30, %v368_v46 }
  0xd0   :  { %v263_v52 = vrot.slane %v248_v23, 7  ;;  %v265_v32 = vrot.slane %v249_v24, 6  ;;  %v267_v61 = vrot.slane %v250_v33, 5  ;;  %v269_v63 = vrot.slane %v251_v34, 4 }
  0xd1   :  { %v271_v5 = vrot.slane %v252_v35, 3  ;;  %v273_v0 = vrot.slane %v253_v55, 2  ;;  %v275_v36 = vrot.slane %v254_v29, 1  ;;  %v372_v9 = vsel %vm79_vm2, %v371_v31, %v370_v4 }
  0xd2   :  { %v264_v20 = vsel %vm73_vm0, %v263_v52, %v247_v21  ;;  %v377_v41 = vrot.slane %v1683_v40, 2  ;;  %v379_v14 = vrot.slane %v1687_v42, 1  ;;  %v374_v1 = vsel %vm82_vm3, %v373_v37, %v372_v9 }
  0xd3   :  { %v266_v54 = vsel %vm76_vm1, %v265_v32, %v264_v20  ;;  %v436_v23 = vrot.slane %v1653_v50, 5  ;;  %v376_v30 = vsel %vm85_vm4, %v375_v56, %v374_v1  ;;  %v437_v21 = vrot.slane %v1653_v50, 6 }
  0xd4   :  { %v268_v24 = vsel %vm79_vm2, %v267_v61, %v266_v54  ;;  %v438_v31 = vrot.slane %v1653_v50, 7  ;;  %v378_v42 = vsel %vm88_vm5, %v377_v41, %v376_v30  ;;  %v1990_v33 = vrot.slane %v1653_v50, 2 }
  0xd5   :  { %v270_v40 = vsel %vm82_vm3, %v269_v63, %v268_v24  ;;  %v1991_v34 = vrot.slane %v1653_v50, 3  ;;  %v380_v56 = vsel %vm91_vm6, %v379_v14, %v378_v42  ;;  %v1769_v55 = vmul.f32 %v435_v28, %v1460_v53 }
  0xd6   :  { %v1759_v37 = vmul.f32 %v1990_v33, %v1449_v47  ;;  %v272_v54 = vsel %vm85_vm4, %v271_v5, %v270_v40  ;;  %v1772_v29 = vmul.f32 %v436_v23, %v1467_v58  ;;  %v382_v47 = vsel %vm94_vm7, %v380_v56, 0.0 }
  0xd7   :  { %v1764_v35 = vmul.f32 %v1991_v34, %v1454_v48  ;;  %v274_v46 = vsel %vm88_vm5, %v273_v0, %v272_v54  ;;  %v1777_v52 = vmul.f32 %v437_v21, %v1472_v59  ;;  %v1780_v48 = vmul.f32 %v438_v31, %v1479_v62  ;;  %383 = vadd.xlane.f32.xlu0 %v382_v47 }
  0xd8   :  { %v276_v50 = vsel %vm91_vm6, %v275_v36, %v274_v46  ;;  %v455_v53 = vmul.f32 %v1582_v60, %v1666_v51  ;;  %v456_v58 = vmul.f32 %v1582_v60, %v1673_v6  ;;  %v457_v32 = vmul.f32 %v1582_v60, %v1759_v37 }
  0xd9   :  { %v278_v61 = vsel %vm94_vm7, %v276_v50, 0.0  ;;  %v458_v59 = vmul.f32 %v1582_v60, %v1764_v35  ;;  %v459_v62 = vmul.f32 %v1582_v60, %v1769_v55  ;;  %v460_v63 = vmul.f32 %v1582_v60, %v1772_v29 }
  0xda   :  { %279 = vadd.xlane.f32.xlu1 %v278_v61  ;;  %v461_v5 = vmul.f32 %v1582_v60, %v1777_v52  ;;  %v462_v0 = vmul.f32 %v1582_v60, %v1780_v48  ;;  %v471_v36 = vrot.slane %v456_v58, 7  ;;  %v473_v4 = vrot.slane %v457_v32, 6 }
  0xdb   :  { %v475_v20 = vrot.slane %v458_v59, 5  ;;  %v477_v9 = vrot.slane %v459_v62, 4  ;;  %v575_v41 = vrot.slane %v1700_v7, 7  ;;  %v479_v1 = vrot.slane %v460_v63, 3 }
  0xdc   :  { %v472_v14 = vsel %vm73_vm0, %v471_v36, %v455_v53  ;;  %v481_v28 = vrot.slane %v461_v5, 2  ;;  %v577_v23 = vrot.slane %v1704_v2, 6  ;;  %v483_v30 = vrot.slane %v462_v0, 1 }
  0xdd   :  { %v474_v24 = vsel %vm76_vm1, %v473_v4, %v472_v14  ;;  %v576_v21 = vsel %vm73_vm0, %v575_v41, %v1696_v25  ;;  %v579_v60 = vrot.slane %v1708_v39, 5  ;;  %v581_v7 = vrot.slane %v1711_v13, 4 }
  0xde   :  { %v476_v31 = vsel %vm79_vm2, %v475_v20, %v474_v24  ;;  %v578_v40 = vsel %vm76_vm1, %v577_v23, %v576_v21  ;;  %v583_v42 = vrot.slane %v1714_v8, 3  ;;  %v585_v34 = vrot.slane %v1718_v18, 2 }
  0xdf   :  { %v478_v33 = vsel %vm82_vm3, %v477_v9, %v476_v31  ;;  %v580_v2 = vsel %vm79_vm2, %v579_v60, %v578_v40  ;;  %v547_v54 = vrot.slane %v1626_v38, 7  ;;  %v587_v56 = vrot.slane %v1721_v26, 1 }
  0xe0   :  { %v480_v25 = vsel %vm85_vm4, %v479_v1, %v478_v33  ;;  %v582_v39 = vsel %vm82_vm3, %v581_v7, %v580_v2  ;;  %v549_v46 = vrot.slane %v1629_v43, 6  ;;  %v551_v50 = vrot.slane %v1632_v44, 5 }
  0xe1   :  { %v482_v13 = vsel %vm88_vm5, %v481_v28, %v480_v25  ;;  %v584_v8 = vsel %vm85_vm4, %v583_v42, %v582_v39  ;;  %v548_v47 = vsel %vm73_vm0, %v547_v54, %v1619_v27  ;;  %v553_v58 = vrot.slane %v1635_v17, 4  ;;  %v167_v25 = vld [vmem:[%s1980_s2] sm:$0xff]  ;;  %s1250_s2 = smov 126  }
  0xe2   :  { %v484_v18 = vsel %vm91_vm6, %v483_v30, %v482_v13  ;;  %v586_v38 = vsel %vm88_vm5, %v585_v34, %v584_v8  ;;  %v550_v53 = vsel %vm76_vm1, %v549_v46, %v548_v47  ;;  %v555_v61 = vrot.slane %v1638_v45, 3 }
  0xe3   :  { %v486_v26 = vsel %vm94_vm7, %v484_v18, 0.0  ;;  %v1830_v43 = vsel %vm91_vm6, %v587_v56, %v586_v38  ;;  %v552_v32 = vsel %vm79_vm2, %v551_v50, %v550_v53  ;;  %v557_v44 = vrot.slane %v1643_v49, 2 }
  0xe4   :  { %487 = vadd.xlane.f32.xlu1 %v486_v26  ;;  %v554_v27 = vsel %vm82_vm3, %v553_v58, %v552_v32  ;;  %v604_v59 = vrot.slane %v1585_v10, 7  ;;  %v559_v17 = vrot.slane %v1646_v22, 1  ;;  %v606_v63 = vrot.slane %v1588_v11, 6 }
  0xe5   :  { %v556_v62 = vsel %vm85_vm4, %v555_v61, %v554_v27  ;;  %v608_v45 = vrot.slane %v1591_v12, 5  ;;  %v610_v10 = vrot.slane %v1594_v15, 4  ;;  %v633_v4 = vrot.slane %v1673_v6, 7 }
  0xe6   :  { %v558_v5 = vsel %vm88_vm5, %v557_v44, %v556_v62  ;;  %v605_v0 = vsel %vm73_vm0, %v604_v59, %v1577_v57  ;;  %v612_v11 = vrot.slane %v1597_v16, 3  ;;  %v635_v20 = vrot.slane %v1759_v37, 6 }
  0xe7   :  { %v1845_v36 = vsel %vm91_vm6, %v559_v17, %v558_v5  ;;  %v607_v49 = vsel %vm76_vm1, %v606_v63, %v605_v0  ;;  %v614_v57 = vrot.slane %v1600_v19, 2  ;;  %v634_v12 = vsel %vm73_vm0, %v633_v4, %v1666_v51 }
  0xe8   :  { %v609_v22 = vsel %vm79_vm2, %v608_v45, %v607_v49  ;;  %v637_v41 = vrot.slane %v1764_v35, 5  ;;  %v616_v15 = vrot.slane %v1608_v3, 1  ;;  %v636_v6 = vsel %vm76_vm1, %v635_v20, %v634_v12 }
  0xe9   :  { %v611_v9 = vsel %vm82_vm3, %v610_v10, %v609_v22  ;;  %v639_v1 = vrot.slane %v1769_v55, 4  ;;  %v641_v28 = vrot.slane %v1772_v29, 3  ;;  %v643_v35 = vrot.slane %v1777_v52, 2 }
  0xea   :  { %v613_v14 = vsel %vm85_vm4, %v612_v11, %v611_v9  ;;  %v638_v37 = vsel %vm79_vm2, %v637_v41, %v636_v6  ;;  %v645_v3 = vrot.slane %v1780_v48, 1  ;;  %v1247_v30 = vmov 1   ;;  %v663_v6 = vld [vmem:[%s1984_s6] sm:$0xff] }
  0xeb   :  { %v615_v16 = vsel %vm88_vm5, %v614_v57, %v613_v14  ;;  %v640_v51 = vsel %vm82_vm3, %v639_v1, %v638_v37  ;;  %1154 = vset.pattern.permute.xlu0 %v1247_v30  ;;  %v1248_v21 = vmov 0   ;;  %v165_v60 = vstv %s44_s4  ;;  %v661_v1 = vld [vmem:[%s1981_s3] sm:$0xff] }
  0xec   :  { %v1866_v19 = vsel %vm91_vm6, %v616_v15, %v615_v16  ;;  %v642_v23 = vsel %vm85_vm4, %v641_v28, %v640_v51  ;;  %1153 = vset.pattern.permute.xlu1 %v1248_v21  ;;  %712 = vmatprep.mubr.bf16.mxu1 %v1248_v21  ;;  %v171_v50 = vmax.f32 %v167_v25, 0.0  ;;  %v173_v58 = vstv %s1080_s26  ;;  %v1162_v28 = vld [vmem:[%s1983_s5 + $0x4] ss:$8 sps:$4 sm:$0xff]  }
  0xed   :  { %v644_v24 = vsel %vm88_vm5, %v643_v35, %v642_v23  ;;  %vm168_vm12 = vcmp.ne.f32.partialorder %v167_v25, -1.0  ;;  %v1249_v0 = vmov 0.0   ;;  %v1253_v14 = vmov 2   ;;  %v1160_v23 = vld [vmem:[%s1983_s5] ss:$8 sps:$4 sm:$0xff]  }
  0xee   :  { %v1874_v55 = vsel %vm91_vm6, %v645_v3, %v644_v24  ;;  %v172_v53 = vsub.f32 0.0, %v171_v50  ;;  %v1083_v45 = vsel %vm168_vm12, 1.0, %v1249_v0  ;;  %v1254_v15 = vmov 3  }
  0xef   :  { %v1085_v16 = vcombine.high %v663_v6, %v663_v6  ;;  %v1084_v37 = vcombine.low %v663_v6, %v663_v6  ;;  %v662_v35 = vpack.c.bf16 %v661_v1, %v661_v1  ;;  %vm981_vm0 = vcmask 523264  }
  0xf0   :  { %v174_v26 = vmul.f32 %v173_v58, %v172_v53  ;;  %v1174_v53 = vld [vmem:[%s1986_s8 + $0x60] sm:$0xff]   ;;  %v1176_v58 = vld [vmem:[%s1986_s8 + $0x68] sm:$0xff]   ;;  %vm1064_vm1 = vcmask 57344  }
  0xf1   :  { %1086 = vmatprep.subr.msk.bf16.mxu1 %vm673_vm13, %v1085_v16  ;;  %v675_v51 = vsel %vm673_vm13, %v1084_v37, 0 }
  0xf2   :  { %v175_v61 = vmul.f32 1.442695, %v174_v26  ;;  %681 = vmatpush1.bf16.msra.mxu1 %v675_v51 }
  0xf3   :  { %744 = vmatprep.subr.bf16.mxu1 %v1162_v28 }
  0xf5   :  { %1087 = vmatmul.mubr.msk.bf16.vlgmr.msra.gmra.mrb[0].mxu1 %vm669_vm14, %v662_v35 }
  0xf6   :  { %745 = vmatpush1.bf16.msra.mxu1 %v1160_v23  ;;  %776 = vmatprep.mubr.bf16.mxu1 %v1248_v21 }
 0x15b   :  { %v164_v29 = vpop.xlane.xlu0 %163 }
 0x15c   :  { %v166_v40 = vadd.f32 %v165_v60, %v164_v29 }
 0x164   :  { %v384_v7 = vpop.xlane.xlu0 %383 }
 0x165   :  { %v385_v42 = vadd.f32 %v384_v7, %v165_v60 }
 0x167   :  { %v280_v52 = vpop.xlane.xlu1 %279 }
 0x168   :  { %v281_v31 = vadd.f32 %v280_v52, %v165_v60 }
 0x16a   :  { %v490_v48 = vmax.f32 %v166_v40, %v281_v31 }
 0x16c   :  { %v491_v33 = vmax.f32 %v490_v48, %v385_v42 }
 0x171   :  { %v488_v2 = vpop.xlane.xlu1 %487 }
 0x172   :  { %v489_v34 = vadd.f32 %v488_v2, %v165_v60  ;;  %v1165_v2 = vld [vmem:[%s1983_s5 + $0x14] ss:$8 sps:$4 sm:$0xff]  }
 0x173   :  { %746 = vmatprep.subr.bf16.mxu1 %v1165_v2 }
 0x174   :  { %v492_v54 = vmax.f32 %v491_v33, %v489_v34 }
 0x176   :  { %v493_v39 = vsub.f32 %v166_v40, %v492_v54  ;;  %v496_v56 = vsub.f32 %v281_v31, %v492_v54  ;;  %v499_v46 = vsub.f32 %v385_v42, %v492_v54  ;;  %v502_v13 = vsub.f32 %v489_v34, %v492_v54  ;;  %v1166_v54 = vld [vmem:[%s1986_s8 + $0x40] sm:$0xff]  }
 0x177   :  { %1113 = vmatprep.subr.bf16.mxu0 %v1166_v54 }
 0x178   :  { %v494_v8 = vmul.f32 1.442695, %v493_v39  ;;  %v497_v47 = vmul.f32 1.442695, %v496_v56  ;;  %v500_v18 = vmul.f32 1.442695, %v499_v46 }
 0x179   :  { %v503_v38 = vmul.f32 1.442695, %v502_v13  ;;  %v1169_v56 = vld [vmem:[%s1986_s8 + $0x8] sm:$0xff]   ;;  %v1170_v46 = vld [vmem:[%s1986_s8 + $0x50] sm:$0xff]  }
 0x17a   :  { %1190 = vpow2.f32 %v494_v8 }
 0x17b   :  { %1192 = vpow2.f32 %v497_v47  ;;  %v1171_v47 = vld [vmem:[%s1986_s8 + $0x10] sm:$0xff]  }
 0x17c   :  { %1194 = vpow2.f32 %v500_v18 }
 0x17d   :  { %1196 = vpow2.f32 %v503_v38  ;;  %v1173_v38 = vld [vmem:[%s1986_s8 + $0x18] sm:$0xff]  }
 0x17e   :  { %1198 = vpow2.f32 %v175_v61 }
 0x184   :  { %v1191_v32 = vpop.eup %1190 }
 0x185   :  { %v1193_v27 = vpop.eup %1192 }
 0x186   :  { %v505_v44 = vadd.f32 %v1193_v27, %v1191_v32  ;;  %v1195_v59 = vpop.eup %1194 }
 0x187   :  { %v1197_v17 = vpop.eup %1196 }
 0x188   :  { %v506_v62 = vadd.f32 %v1195_v59, %v505_v44  ;;  %v1199_v5 = vpop.eup %1198 }
 0x189   :  { %v177_v49 = vmul.f32 %v1199_v5, %v1083_v45  ;;  %v1179_v5 = vld [vmem:[%s1986_s8 + $0x30] sm:$0xff]   ;;  %v1180_v45 = vld [vmem:[%s1986_s8 + $0x78] sm:$0xff]  }
 0x18a   :  { %v507_v63 = vadd.f32 %v1197_v17, %v506_v62 }
 0x18c   :  { %1200 = vrcp.f32 %v507_v63  ;;  %v1178_v63 = vld [vmem:[%s1986_s8 + $0x70] sm:$0xff]  }
 0x196   :  { %v1201_v10 = vpop.eup %1200 }
 0x197   :  { %v513_v4 = vmul.f32 %v1201_v10, %v1195_v59  ;;  %v511_v22 = vmul.f32 %v1201_v10, %v1193_v27  ;;  %v515_v9 = vmul.f32 %v1201_v10, %v1197_v17  ;;  %v509_v12 = vmul.f32 %v1201_v10, %v1191_v32  ;;  %v1177_v17 = vld [vmem:[%s1986_s8 + $0x28] sm:$0xff]  }
 0x198   :  { %v787_v10 = vlaneseq }
 0x199   :  { %v514_v11 = vmul.f32 %v513_v4, %v177_v49  ;;  %v512_v20 = vmul.f32 %v511_v22, %v177_v49  ;;  %v516_v57 = vmul.f32 %v515_v9, %v177_v49  ;;  %v510_v41 = vmul.f32 %v509_v12, %v177_v49  ;;  %v1181_v49 = vld [vmem:[%s1986_s8 + $0x38] sm:$0xff]  }
 0x19a   :  { %v788_v4 = vshrl.u32 %v787_v10, 7 }
 0x19b   :  { %523 = vrot.lane.b32.xlu1 %v514_v11, %s1250_s2  ;;  %518 = vrot.lane.b32.xlu0 %v512_v20, %s1251_s29 }
 0x19c   :  { %v789_v22 = vsub.s32 0, %v788_v4 }
 0x19f   :  { %528 = vrot.lane.b32.xlu1 %v516_v57, %s1252_s30  ;;  %564 = vperm.xlu0 %1154, %v512_v20   ;;  %v793_v20 = vsub.s32 1, %v788_v4 }
 0x1a3   :  { %536 = vperm.xlu1 %1153, %v510_v41   ;;  %1157 = vset.pattern.permute.xlu0 %v1248_v21  ;;  %v1163_v21 = vld [vmem:[%s1983_s5 + $0x10] ss:$8 sps:$4 sm:$0xff]  }
 0x1a4   :  { %747 = vmatpush1.bf16.msra.mxu1 %v1163_v21 }
 0x1a5   :  { %1137 = vmatprep.subr.mxu1 %v1249_v0 }
 0x1a7   :  { %1155 = vset.pattern.permute.xlu1 %v1253_v14 }
 0x1a8   :  { %593 = vperm.xlu1 %1155, %v514_v11   ;;  %v785_v11 = vld [vmem:[%s1985_s7] sm:$0x3] }
 0x1a9   :  { %v790_v9 = vrot.slane %v785_v11, %v789_v22  ;;  %v794_v12 = vrot.slane %v785_v11, %v793_v20 }
 0x1ac   :  { %1156 = vset.pattern.permute.xlu1 %v1254_v15 }
 0x1ad   :  { %622 = vperm.xlu1 %1156, %v516_v57  }
 0x1c8   :  { %v714_v26 = vpop.f32.mrb[0].mxu1 }
 0x1c9   :  { %v716_v32 = vpop.f32.mrb[1].mxu1 }
 0x1ca   :  { %v718_v61 = vpop.f32.mrb[2].mxu1 }
 0x1cb   :  { %v719_v27 = vpop.f32.mrb[3].mxu1 }
 0x20d   :  { %v524_v3 = vpop.permute.xlu1 %523  ;;  %v519_v24 = vpop.permute.xlu0 %518 }
 0x20e   :  { %v521_v30 = vadd.f32 %v519_v24, %v510_v41  ;;  %v1093_v24 = vld [vmem:[%s1987_s9] ss:$0 sm:$0xff]  ;;  %s1256_s9 = smov [#allocation4]  }
 0x20f   :  { %s1072_s2 = sshll.u32 %s1256_s9, 4  ;;  %s1073_s2 = int_to_ptr.vmem [resolvable:$true] %s1072_s2 }
 0x210   :  { %v526_v29 = vadd.f32 %v524_v3, %v521_v30  ;;  %s1220_s29 = scalar_lea.vmem %s1073_s2, 16  ;;  %p1225_p6 = scmp.lt.s32.totalorder %s1073_s2, %s1073_s2 }
 0x211   :  { %v529_v60 = vpop.permute.xlu1 %528  ;;  %p1221_p5 = scmp.ne.s32.totalorder %s1073_s2, %s1220_s29 }
 0x212   :  { %v531_v52 = vadd.f32 %v529_v60, %v526_v29 }
 0x214   :  { %v532_v31 = vmax.f32 %v531_v52, 1e-08 }
 0x216   :  { %1202 = vrcp.f32 %v532_v31 }
 0x21e   :  { %v565_v7 = vpop.permute.xlu0 %564 }
 0x21f   :  { %v590_v42 = vmul.f32 %v1830_v43, %v565_v7  ;;  %v1167_v43 = vld [vmem:[%s1986_s8] sm:$0xff]  }
 0x220   :  { %v1203_v40 = vpop.eup %1202  ;;  %1114 = vmatpush3.bf16.msra.mxu0 %v1167_v43  ;;  %v979_v7 = vld [vmem:[%s1988_s10] sm:$0x1]  ;;  %s1224_s10 = scalar_lea.vmem %s1073_s2, 32 }
 0x221   :  { %652 = vperm.xlu0 %1157, %v1203_v40   ;;  %p1226_p7 = scmp.lt.s32.totalorder %s1224_s10, %s1220_s29 }
 0x222   :  { %v537_v48 = vpop.permute.xlu1 %536 }
 0x223   :  { %v562_v33 = vmul.f32 %v1845_v36, %v537_v48  ;;  %v1168_v36 = vld [vmem:[%s1986_s8 + $0x48] sm:$0xff]   ;;  %p1227_p8 = por %p1226_p7, %p1225_p6 }
 0x224   :  { %1115 = vmatprep.subr.bf16.mxu0 %v1168_v36 }
 0x225   :  { %v591_v34 = vadd.f32 %v590_v42, %v562_v33  ;;  %1116 = vmatpush3.bf16.msra.mxu0 %v1169_v56  ;;  %p1228_p9 = pnand %p1227_p8, %p1221_p5 }
 0x226   :  { %1117 = vmatprep.subr.bf16.mxu0 %v1170_v46 }
 0x227   :  { %v594_v25 = vpop.permute.xlu1 %593 }
 0x228   :  { %v619_v39 = vmul.f32 %v1866_v19, %v594_v25  ;;  %v1172_v19 = vld [vmem:[%s1986_s8 + $0x58] sm:$0xff]  }
 0x229   :  { %1118 = vmatpush3.bf16.msra.mxu0 %v1171_v47 }
 0x22a   :  { %v620_v13 = vadd.f32 %v619_v39, %v591_v34  ;;  %1119 = vmatprep.subr.bf16.mxu0 %v1172_v19 }
 0x22c   :  { %v623_v8 = vpop.permute.xlu1 %622 }
 0x22d   :  { %v648_v50 = vmul.f32 %v1874_v55, %v623_v8  ;;  %1120 = vmatpush3.bf16.msra.mxu0 %v1173_v38  ;;  %v1175_v55 = vld [vmem:[%s1986_s8 + $0x20] sm:$0xff]  }
 0x22e   :  { %1121 = vmatprep.subr.bf16.mxu0 %v1174_v53 }
 0x22f   :  { %v649_v18 = vadd.f32 %v648_v50, %v620_v13 }
 0x231   :  { %1122 = vmatpush3.bf16.msra.mxu0 %v1175_v55 }
 0x232   :  { %1123 = vmatprep.subr.bf16.mxu0 %v1176_v58 }
 0x235   :  { %1124 = vmatpush3.bf16.msra.mxu0 %v1177_v17 }
 0x236   :  { %1125 = vmatprep.subr.bf16.mxu0 %v1178_v63 }
 0x239   :  { %1126 = vmatpush3.bf16.msra.mxu0 %v1179_v5 }
 0x23a   :  { %1127 = vmatprep.subr.bf16.mxu0 %v1180_v45 }
 0x23d   :  { %1128 = vmatpush3.bf16.msra.mxu0 %v1181_v49 }
 0x2a0   :  { %v653_v44 = vpop.permute.xlu0 %652 }
 0x2a1   :  { %v655_v59 = vmul.f32 %v653_v44, %v649_v18 }
 0x2a3   :  { %v656_v62 = vpack.c.bf16 %v655_v59, %v655_v59 }
 0x2a5   :  { %1092 = vmatmul.mubr.msk.bf16.vlgmr.msra.gmra.mrb[4].mxu1 %vm94_vm7, %v656_v62 }
 0x2a6   :  { %1139 = vmatprep.mubr.msk.f32.mxu1 %vm1255_vm15, %v1249_v0  ;;  %v980_v0 = vstv %s1081_s28 }
 0x378   :  { %v778_v57 = vpop.f32.mrb[4].mxu1 }
 0x379   :  { %v779_v41 = vadd.f32 %v778_v57, %v714_v26  ;;  %v780_v14 = vpop.f32.mrb[5].mxu1 }
 0x37a   :  { %v781_v15 = vadd.f32 %v780_v14, %v716_v32  ;;  %v782_v6 = vpop.f32.mrb[6].mxu1 }
 0x37b   :  { %v797_v1 = vadd.f32 %v790_v9, %v779_v41  ;;  %v783_v16 = vpop.f32.mrb[7].mxu1 }
 0x37c   :  { %v798_v37 = vadd.f32 %v794_v12, %v781_v15 }
 0x37d   :  { %v799_v28 = vmax.f32 %v797_v1, 0.0 }
 0x37e   :  { %v800_v51 = vmax.f32 %v798_v37, 0.0 }
 0x37f   :  { %v801_v23 = vpack.c.bf16 %v799_v28, %v799_v28 }
 0x380   :  { %v802_v35 = vpack.c.bf16 %v800_v51, %v800_v51 }
 0x382   :  { %970 = vmatprep.mubr.bf16.mxu0 %v802_v35 }
 0x383   :  { %971 = vmatmul.mubr.bf16.vlgmr.msra.gmra.mrb[0].mxu0 %v801_v23 }
 0x456   :  { %v1129_v3 = vpop.f32.mrb[0].mxu0 }
 0x457   :  { %v1130_v30 = vpop.f32.mrb[1].mxu0 }
 0x458   :  { %v1131_v29 = vadd.f32 %v1130_v30, %v1129_v3  ;;  %v1132_v60 = vpop.f32.mrb[2].mxu0 }
 0x459   :  { %v1133_v52 = vpop.f32.mrb[3].mxu0 }
 0x45a   :  { %v973_v31 = vadd.f32 %v1131_v29, %v1093_v24 }
 0x45c   :  { %v978_v40 = vmax.f32 %v973_v31, 0.0 }
 0x45e   :  { %1138 = vmatpush3.xpose.msk.msra.mxu1 %vm981_vm0, %v978_v40 }
 0x461   :  { %1140 = vmatmul.mubr.msk.f32.vlgmr.msra.gmra.mrb[8].mxu1 %vm981_vm0, %v979_v7 }
 0x534   :  { %v1054_v48 = vpop.f32.mrb[8].mxu1 }
 0x535   :  { %v1055_v42 = vadd.f32 %v1054_v48, %v980_v0  ;;  %v1141_v33 = vpop.f32.mrb[9].mxu1 }
 0x537   :  { %v1112_v21 = vmul.f32 -1.442695, %v1055_v42 }
 0x539   :  { %1204 = vpow2.f32 %v1112_v21 }
 0x543   :  { %v1205_v2 = vpop.eup %1204 }
 0x544   :  { %v1061_v34 = vadd.f32 1.0, %v1205_v2 }
 0x546   :  { %1206 = vrcp.f32 %v1061_v34 }
 0x550   :  { %v1207_v54 = vpop.eup %1206 }
 0x551   :  { %1065 = vst.msk [vmem:[#allocation4] sm:$0x1] %vm1064_vm1, %v1207_v54 }
 0x552   :  { %1231 = shalt.err (!%p1228_p9)
}
 0x553   :  { %s1232_s13 = scalar_lea.hbm %s1989_s11, 16 }
 0x554   :  { %p1233_p10 = scmp.ne.s32.totalorder %s1989_s11, %s1232_s13  ;;  %p1236_p11 = scmp.lt.u32.totalorder %s1232_s13, %s1989_s11 }
 0x556   :  { %p1238_p12 = pnand %p1236_p11, %p1233_p10 }
 0x558   :  { %1241 = shalt.err (!%p1238_p12)
}
 0x559   :  { %1075 = dma.vmem_to_hbm [thread:$0]  %s1073_s2, 16, %s1989_s11, [#allocation5]  }
 0x55a   :  { %1244 = dma.done.wait [#allocation5], 16  }
 0x55b   :  { %1245 = vsyncadd [#allocation5], 4294967280 }
 0x55c   :  { %1079 = vsyncpa [#allocation5], 1 }

</bundles_post_ra>
